<compile_context>
chip_gen: v7x
topology: tpu7x:2x2x1
jax: 0.10.0
libtpu: 0.0.40
codegen_flags: <defaults>
</compile_context>

<pallas_src>
import functools

import jax
import jax.numpy as jnp
from jax import lax
from jax.experimental import pallas as pl
from jax.experimental.pallas import tpu as pltpu


# ----------------------------------------------------------------------------
# Tiling plan (host side, all static Python ints)
# ----------------------------------------------------------------------------
def _pick_batch_tile(n, bt_cap):
    """Pick the batch tile BT and the (possibly padded) batch extent."""
    bt_cap = max(1, min(bt_cap, n))
    # Prefer a divisor of N (no padded-zero reads) that obeys the sublane rule:
    # BT % 8 == 0, or BT == N (full-extent block).
    valid = [bt for bt in range(1, bt_cap + 1)
             if n % bt == 0 and (bt % 8 == 0 or bt == n)]
    if valid:
        multi = [bt for bt in valid if bt < n]   # >=2 batch grid steps when possible
        return (max(multi) if multi else max(valid)), n
    bt = max(8, (bt_cap // 8) * 8)               # fallback: pad the batch
    return bt, ((n + bt - 1) // bt) * bt


def _plan_tiling(n, c, hw, itemsize, block_budget):
    """Pick (lane_chunk, BT, N_padded) for the packed (N, C*HW) view."""
    row_bytes = c * hw * itemsize
    if row_bytes <= block_budget:
        lane_chunk = c * hw                      # whole row per chunk (== full dim)
    else:
        # Chunk the lane axis.  A chunk must be a multiple of 128 (layout rule),
        # divide C*HW exactly, and either cover whole channels (multiple of HW)
        # or sit inside a single channel (divisor of HW).
        lane_chunk = c * hw                      # fallback: whole row (over budget)
        cand = max(128, (block_budget // itemsize) // 128 * 128)
        while cand >= 128:
            if (c * hw) % cand == 0 and (cand % hw == 0 or hw % cand == 0):
                lane_chunk = cand
                break
            cand -= 128
    bt_cap = max(1, block_budget // (lane_chunk * itemsize))
    bt, n_pad = _pick_batch_tile(n, bt_cap)
    return lane_chunk, bt, n_pad


# ----------------------------------------------------------------------------
# Kernel
#   x_ref   : (BT, lane_chunk)  one lane chunk of the packed (N, C*HW) view
#   w1_ref  : (mid, C)          fc1 folded weight
#   b1_ref  : (1, mid)          fc1 folded bias
#   w2t_ref : (mid, C)          fc2 folded weight (transposed)
#   b2_ref  : (1, C)            fc2 folded bias
#   out_ref : (BT, C)           sigmoid(channel attention)
#   sum_acc, max_acc : (BT, C)  f32 running-sum / running-max accumulators
# ----------------------------------------------------------------------------
def _channel_attention_kernel(x_ref, w1_ref, b1_ref, w2t_ref, b2_ref, out_ref,
                              sum_acc, max_acc, *, hw, c, bt, mid, lane_chunk):
    g = pl.program_id(1)

    # ---- init the running sum / max at the first lane chunk of this tile ------
    @pl.when(g == 0)
    def _init():
        sum_acc[...] = jnp.zeros_like(sum_acc)
        max_acc[...] = jnp.full_like(max_acc, -jnp.inf)

    # ---- pooling: reduce this chunk and fold it into the accumulators ---------
    if lane_chunk >= hw:
        # Chunk covers k whole channels; reduce one HW-wide segment at a time so
        # only a single segment is live (no whole-block materialization).
        k = lane_chunk // hw
        s_cols, m_cols = [], []
        for j in range(k):
            seg = x_ref[:, j * hw:(j + 1) * hw].astype(jnp.float32)   # (BT, HW)
            s_cols.append(jnp.sum(seg, axis=1, keepdims=True))        # (BT, 1)
            m_cols.append(jnp.max(seg, axis=1, keepdims=True))        # (BT, 1)
        if k == c:
            # Single chunk spans every channel -> whole-scratch update.
            s = s_cols[0] if k == 1 else jnp.concatenate(s_cols, axis=1)
            m = m_cols[0] if k == 1 else jnp.concatenate(m_cols, axis=1)
            sum_acc[...] += s
            max_acc[...] = jnp.maximum(max_acc[...], m)
        else:
            col_ids = lax.broadcasted_iota(jnp.int32, (bt, c), 1)
            for j in range(k):
                msk = col_ids == (g * k + j)
                sum_acc[...] += jnp.where(msk, s_cols[j], 0.0)
                max_acc[...] = jnp.where(
                    msk, jnp.maximum(max_acc[...], m_cols[j]), max_acc[...])
    else:
        # Sub-channel chunk: the whole chunk belongs to one channel.
        cpc = hw // lane_chunk                   # chunks per channel (static)
        ch = g // cpc
        seg = x_ref[...].astype(jnp.float32)
        s = jnp.sum(seg, axis=1, keepdims=True)
        m = jnp.max(seg, axis=1, keepdims=True)
        col_ids = lax.broadcasted_iota(jnp.int32, (bt, c), 1)
        msk = col_ids == ch
        sum_acc[...] += jnp.where(msk, s, 0.0)
        max_acc[...] = jnp.where(msk, jnp.maximum(max_acc[...], m), max_acc[...])

    # ---- finalize: tiny fused MLP (avg & max stacked) + sigmoid ---------------
    @pl.when(g == pl.num_programs(1) - 1)
    def _finalize():
        avg_p = sum_acc[...] * (1.0 / hw)                       # (BT, C)
        max_p = max_acc[...]
        p = jnp.concatenate([avg_p, max_p], axis=0)             # (2*BT, C)

        # fc1 (C -> mid): folded depthwise centre tap + bias.  Kept on the VPU
        # (broadcast multiply + lane reduce); the MXU would be >95% padding here.
        w1 = w1_ref[...]                                        # (mid, C)
        cols = [jnp.sum(p * w1[i:i + 1, :], axis=1, keepdims=True)
                for i in range(mid)]
        t = cols[0] if mid == 1 else jnp.concatenate(cols, axis=1)   # (2*BT, mid)
        t = jnp.maximum(t + b1_ref[...], 0.0)                   # ReLU

        # fc2 (mid -> C)
        w2t = w2t_ref[...]                                      # (mid, C)
        o = t[:, 0:1] * w2t[0:1, :]                             # (2*BT, C)
        for i in range(1, mid):
            o = o + t[:, i:i + 1] * w2t[i:i + 1, :]
        o = o + b2_ref[...]

        # Recombine stacked avg/max halves; sigmoid on the EUP.
        out_ref[...] = jax.nn.sigmoid(o[:bt, :] + o[bt:, :]).astype(out_ref.dtype)


# ----------------------------------------------------------------------------
# Parameter init (PyTorch-layout tensors) and host-side folding
# ----------------------------------------------------------------------------
def init_params(key, c, ratio=16):
    mid = max(c // ratio, 1)
    ks = iter(jax.random.split(key, 16))

    def rnd(shape, s=0.3):
        return s * jax.random.normal(next(ks), shape, jnp.float32)

    return {
        "fc1_dw_w": rnd((c, 1, 3, 3)),   "fc1_dw_b": rnd((c,)),
        "fc1_pw_w": rnd((mid, c, 1, 1)), "fc1_pw_b": rnd((mid,)),
        "fc2_dw_w": rnd((mid, 1, 3, 3)), "fc2_dw_b": rnd((mid,)),
        "fc2_pw_w": rnd((c, mid, 1, 1)), "fc2_pw_b": rnd((c,)),
    }


def prepare_kernel_params(P):
    """Fold the 1x1-spatial depthwise convs (centre tap + bias) into the
    pointwise weights/biases — exact for the 1x1 pooled inputs fc1/fc2 see."""
    c = P["fc1_dw_w"].shape[0]
    mid = P["fc1_pw_w"].shape[0]

    d1 = P["fc1_dw_w"][:, 0, 1, 1]                 # (C,)   centre taps
    db1 = P["fc1_dw_b"]                            # (C,)
    w1 = P["fc1_pw_w"].reshape(mid, c)             # (mid, C)
    pb1 = P["fc1_pw_b"]                            # (mid,)

    d2 = P["fc2_dw_w"][:, 0, 1, 1]                 # (mid,)
    db2 = P["fc2_dw_b"]                            # (mid,)
    w2 = P["fc2_pw_w"].reshape(c, mid)             # (C, mid)
    pb2 = P["fc2_pw_b"]                            # (C,)

    w1f = (w1 * d1[None, :]).astype(jnp.float32)                    # (mid, C)
    b1f = (w1 @ db1 + pb1).reshape(1, mid).astype(jnp.float32)      # (1, mid)
    w2tf = (w2 * d2[None, :]).T.astype(jnp.float32)                 # (mid, C)
    b2f = (w2 @ db2 + pb2).reshape(1, c).astype(jnp.float32)        # (1, C)
    return (w1f, b1f, w2tf, b2f)


# ----------------------------------------------------------------------------
# Wrapper
# ----------------------------------------------------------------------------
def channel_attention(x_nchw, P, *, block_budget_bytes=4 * 1024 * 1024):
    N, C, H, W = x_nchw.shape
    HW = H * W
    mid = P["fc1_pw_w"].shape[0]
    # NOTE: under jit this folding traces to a few cheap XLA ops; hoist it if the
    # wrapper is ever called un-jitted in a hot loop.
    kparams = prepare_kernel_params(P)

    lane_chunk, BT, Np = _plan_tiling(N, C, HW, x_nchw.dtype.itemsize,
                                      block_budget_bytes)

    # NCHW -> (N, C*HW): pure reshape (no transpose, no dtype cast -> bf16 inputs
    # keep their halved HBM footprint; the kernel accumulates in f32).
    x = x_nchw.reshape(N, C * HW)
    if Np != N:                                   # only the fallback tiling pads
        x = jnp.pad(x, ((0, Np - N), (0, 0)))

    grid = (Np // BT, (C * HW) // lane_chunk)

    in_specs = [pl.BlockSpec((BT, lane_chunk), lambda b, g: (b, g))]
    in_specs += [pl.BlockSpec(p.shape, lambda b, g: (0, 0)) for p in kparams]

    kernel = functools.partial(_channel_attention_kernel, hw=HW, c=C, bt=BT,
                               mid=mid, lane_chunk=lane_chunk)

    # TODO(synk): output is left as (BT, C) blocks; a lane-dense (1, BT*C) slab
    # would need an in-kernel sublane->lane reshape and the output is only N*C
    # floats, so the masked-store cost is negligible here.
    out = pl.pallas_call(
        kernel,
        grid=grid,
        in_specs=in_specs,
        out_specs=pl.BlockSpec((BT, C), lambda b, g: (b, 0)),
        out_shape=jax.ShapeDtypeStruct((Np, C), x_nchw.dtype),
        scratch_shapes=[pltpu.VMEM((BT, C), jnp.float32),   # running sum
                        pltpu.VMEM((BT, C), jnp.float32)],  # running max
        compiler_params=pltpu.CompilerParams(
            dimension_semantics=("parallel", "arbitrary"),
            vmem_limit_bytes=32 * 1024 * 1024),
    )(x, *kparams)

    return out[:N].reshape(N, C, 1, 1)


# ----------------------------------------------------------------------------
# Pure-JAX reference (mirrors the PyTorch forward exactly)
# ----------------------------------------------------------------------------
def ref_forward(x, P):
    def conv(z, w, b=None, pad=0, groups=1):
        y = lax.conv_general_dilated(
            z, w, (1, 1), [(pad, pad), (pad, pad)],
            dimension_numbers=("NCHW", "OIHW", "NCHW"),
            feature_group_count=groups)
        if b is not None:
            y = y + b[None, :, None, None]
        return y

    def dsconv(z, dw_w, dw_b, pw_w, pw_b):
        y = conv(z, dw_w, dw_b, pad=1, groups=z.shape[1])
        return conv(y, pw_w, pw_b)

    avg = jnp.mean(x, axis=(2, 3), keepdims=True)
    mx = jnp.max(x, axis=(2, 3), keepdims=True)

    def path(p):
        t = dsconv(p, P["fc1_dw_w"], P["fc1_dw_b"], P["fc1_pw_w"], P["fc1_pw_b"])
        t = jnp.maximum(t, 0.0)
        return dsconv(t, P["fc2_dw_w"], P["fc2_dw_b"], P["fc2_pw_w"], P["fc2_pw_b"])

    return jax.nn.sigmoid(path(avg) + path(mx))


# ----------------------------------------------------------------------------
if __name__ == "__main__":
    key = jax.random.PRNGKey(0)
    kx, kp = jax.random.split(key)

    # Primary (demo) config.
    N, C, H, W = 2, 4, 16, 16
    x = jax.random.normal(kx, (N, C, H, W), jnp.float32)
    P = init_params(kp, C, ratio=16)

    out = jax.block_until_ready(channel_attention(x, P))
    ref = ref_forward(x, P)
    assert out.shape == (N, C, 1, 1), out.shape
    err = float(jnp.max(jnp.abs(out - ref)))
    assert err < 1e-3, f"mismatch vs reference (demo): max abs err = {err}"

    # Second config: a tiny block budget forces multiple batch tiles and multiple
    # lane chunks, exercising the accumulator grid axis / pl.when init+finalize.
    N2 = 16
    x2 = jax.random.normal(kx, (N2, C, H, W), jnp.float32)
    out2 = jax.block_until_ready(
        channel_attention(x2, P, block_budget_bytes=2048))
    ref2 = ref_forward(x2, P)
    err2 = float(jnp.max(jnp.abs(out2 - ref2)))
    assert err2 < 1e-3, f"mismatch vs reference (chunked): max abs err = {err2}"

    print("KERNEL_OK")
</pallas_src>

<mosaic_0001>
module attributes {stable_mosaic.version = 11 : i64} {
  func.func @_channel_attention_kernel(%arg0: i32, %arg1: i32, %arg2: memref<2x1024xf32, #tpu.memory_space<vmem>>, %arg3: memref<1x4xf32, #tpu.memory_space<vmem>>, %arg4: memref<1x1xf32, #tpu.memory_space<vmem>>, %arg5: memref<1x4xf32, #tpu.memory_space<vmem>>, %arg6: memref<1x4xf32, #tpu.memory_space<vmem>>, %arg7: memref<2x4xf32, #tpu.memory_space<vmem>>, %arg8: memref<2x4xf32, #tpu.memory_space<vmem>>, %arg9: memref<2x4xf32, #tpu.memory_space<vmem>>) attributes {dimension_semantics = [#tpu.dimension_semantics<parallel>, #tpu.dimension_semantics<arbitrary>], iteration_bounds = array<i64: 1, 1>, scalar_prefetch = 0 : i64, scratch_operands = 2 : i64, tpu.core_type = #tpu.core_type<tc>, window_params = [{transform_indices = @transform_0, window_bounds = array<i64: 2, 1024>}, {pipeline_mode = #tpu.pipeline_mode<synchronous>, transform_indices = @transform_1, window_bounds = array<i64: 1, 4>}, {pipeline_mode = #tpu.pipeline_mode<synchronous>, transform_indices = @transform_2, window_bounds = array<i64: 1, 1>}, {pipeline_mode = #tpu.pipeline_mode<synchronous>, transform_indices = @transform_3, window_bounds = array<i64: 1, 4>}, {pipeline_mode = #tpu.pipeline_mode<synchronous>, transform_indices = @transform_4, window_bounds = array<i64: 1, 4>}, {transform_indices = @transform_5, window_bounds = array<i64: 2, 4>}]} {
    %c0_i32 = arith.constant 0 : i32
    %0 = arith.cmpi eq, %arg1, %c0_i32 : i32
    %1 = arith.extui %0 : i1 to i32
    %c0_i32_0 = arith.constant 0 : i32
    %2 = arith.cmpi ne, %1, %c0_i32_0 : i32
    scf.if %2 {
      %cst_22 = arith.constant 0.000000e+00 : f32
      %34 = vector.broadcast %cst_22 : f32 to vector<2x4xf32>
      %c0_23 = arith.constant 0 : index
      %c0_24 = arith.constant 0 : index
      %35 = vector.load %arg8[%c0_23, %c0_24] : memref<2x4xf32, #tpu.memory_space<vmem>>, vector<2x4xf32>
      tpu.vector_store %arg8[%c0_23, %c0_24], %34 {strides = array<i32>} : memref<2x4xf32, #tpu.memory_space<vmem>>, vector<2x4xf32>,
      %cst_25 = arith.constant 0xFF800000 : f32
      %36 = vector.broadcast %cst_25 : f32 to vector<2x4xf32>
      %c0_26 = arith.constant 0 : index
      %c0_27 = arith.constant 0 : index
      %37 = vector.load %arg9[%c0_26, %c0_27] : memref<2x4xf32, #tpu.memory_space<vmem>>, vector<2x4xf32>
      tpu.vector_store %arg9[%c0_26, %c0_27], %36 {strides = array<i32>} : memref<2x4xf32, #tpu.memory_space<vmem>>, vector<2x4xf32>,
    } else {
    }
    %c0 = arith.constant 0 : index
    %c0_1 = arith.constant 0 : index
    %3 = vector.load %arg2[%c0, %c0_1] : memref<2x1024xf32, #tpu.memory_space<vmem>>, vector<2x256xf32>
    %cst = arith.constant dense<0.000000e+00> : vector<2xf32>
    %4 = vector.multi_reduction <add>, %3, %cst [1] : vector<2x256xf32> to vector<2xf32>
    %5 = vector.shape_cast %4 : vector<2xf32> to vector<2x1xf32>
    %cst_2 = arith.constant dense<0xFF800000> : vector<2xf32>
    %6 = vector.multi_reduction <maximumf>, %3, %cst_2 [1] : vector<2x256xf32> to vector<2xf32>
    %7 = vector.shape_cast %6 : vector<2xf32> to vector<2x1xf32>
    %c0_3 = arith.constant 0 : index
    %c256 = arith.constant 256 : index
    %8 = vector.load %arg2[%c0_3, %c256] : memref<2x1024xf32, #tpu.memory_space<vmem>>, vector<2x256xf32>
    %cst_4 = arith.constant dense<0.000000e+00> : vector<2xf32>
    %9 = vector.multi_reduction <add>, %8, %cst_4 [1] : vector<2x256xf32> to vector<2xf32>
    %10 = vector.shape_cast %9 : vector<2xf32> to vector<2x1xf32>
    %cst_5 = arith.constant dense<0xFF800000> : vector<2xf32>
    %11 = vector.multi_reduction <maximumf>, %8, %cst_5 [1] : vector<2x256xf32> to vector<2xf32>
    %12 = vector.shape_cast %11 : vector<2xf32> to vector<2x1xf32>
    %c0_6 = arith.constant 0 : index
    %c512 = arith.constant 512 : index
    %13 = vector.load %arg2[%c0_6, %c512] : memref<2x1024xf32, #tpu.memory_space<vmem>>, vector<2x256xf32>
    %cst_7 = arith.constant dense<0.000000e+00> : vector<2xf32>
    %14 = vector.multi_reduction <add>, %13, %cst_7 [1] : vector<2x256xf32> to vector<2xf32>
    %15 = vector.shape_cast %14 : vector<2xf32> to vector<2x1xf32>
    %cst_8 = arith.constant dense<0xFF800000> : vector<2xf32>
    %16 = vector.multi_reduction <maximumf>, %13, %cst_8 [1] : vector<2x256xf32> to vector<2xf32>
    %17 = vector.shape_cast %16 : vector<2xf32> to vector<2x1xf32>
    %c0_9 = arith.constant 0 : index
    %c768 = arith.constant 768 : index
    %18 = vector.load %arg2[%c0_9, %c768] : memref<2x1024xf32, #tpu.memory_space<vmem>>, vector<2x256xf32>
    %cst_10 = arith.constant dense<0.000000e+00> : vector<2xf32>
    %19 = vector.multi_reduction <add>, %18, %cst_10 [1] : vector<2x256xf32> to vector<2xf32>
    %20 = vector.shape_cast %19 : vector<2xf32> to vector<2x1xf32>
    %cst_11 = arith.constant dense<0xFF800000> : vector<2xf32>
    %21 = vector.multi_reduction <maximumf>, %18, %cst_11 [1] : vector<2x256xf32> to vector<2xf32>
    %22 = vector.shape_cast %21 : vector<2xf32> to vector<2x1xf32>
    %23 = tpu.concatenate %5, %10, %15, %20 in 1 : vector<2x1xf32>, vector<2x1xf32>, vector<2x1xf32>, vector<2x1xf32> -> vector<2x4xf32>
    %24 = tpu.concatenate %7, %12, %17, %22 in 1 : vector<2x1xf32>, vector<2x1xf32>, vector<2x1xf32>, vector<2x1xf32> -> vector<2x4xf32>
    %c0_12 = arith.constant 0 : index
    %c0_13 = arith.constant 0 : index
    %25 = vector.load %arg8[%c0_12, %c0_13] : memref<2x4xf32, #tpu.memory_space<vmem>>, vector<2x4xf32>
    %26 = arith.addf %25, %23 : vector<2x4xf32>
    %c0_14 = arith.constant 0 : index
    %c0_15 = arith.constant 0 : index
    %27 = vector.load %arg8[%c0_14, %c0_15] : memref<2x4xf32, #tpu.memory_space<vmem>>, vector<2x4xf32>
    tpu.vector_store %arg8[%c0_14, %c0_15], %26 {strides = array<i32>} : memref<2x4xf32, #tpu.memory_space<vmem>>, vector<2x4xf32>,
    %c0_16 = arith.constant 0 : index
    %c0_17 = arith.constant 0 : index
    %28 = vector.load %arg9[%c0_16, %c0_17] : memref<2x4xf32, #tpu.memory_space<vmem>>, vector<2x4xf32>
    %29 = arith.maximumf %28, %24 : vector<2x4xf32>
    %c0_18 = arith.constant 0 : index
    %c0_19 = arith.constant 0 : index
    %30 = vector.load %arg9[%c0_18, %c0_19] : memref<2x4xf32, #tpu.memory_space<vmem>>, vector<2x4xf32>
    tpu.vector_store %arg9[%c0_18, %c0_19], %29 {strides = array<i32>} : memref<2x4xf32, #tpu.memory_space<vmem>>, vector<2x4xf32>,
    %c0_i32_20 = arith.constant 0 : i32
    %31 = arith.cmpi eq, %arg1, %c0_i32_20 : i32
    %32 = arith.extui %31 : i1 to i32
    %c0_i32_21 = arith.constant 0 : i32
    %33 = arith.cmpi ne, %32, %c0_i32_21 : i32
    scf.if %33 {
      %c0_22 = arith.constant 0 : index
      %c0_23 = arith.constant 0 : index
      %34 = vector.load %arg8[%c0_22, %c0_23] : memref<2x4xf32, #tpu.memory_space<vmem>>, vector<2x4xf32>
      %cst_24 = arith.constant 3.906250e-03 : f32
      %35 = vector.broadcast %cst_24 : f32 to vector<2x4xf32>
      %36 = arith.mulf %34, %35 : vector<2x4xf32>
      %c0_25 = arith.constant 0 : index
      %c0_26 = arith.constant 0 : index
      %37 = vector.load %arg9[%c0_25, %c0_26] : memref<2x4xf32, #tpu.memory_space<vmem>>, vector<2x4xf32>
      %38 = tpu.concatenate %36, %37 in 0 : vector<2x4xf32>, vector<2x4xf32> -> vector<4x4xf32>
      %c0_27 = arith.constant 0 : index
      %c0_28 = arith.constant 0 : index
      %39 = vector.load %arg3[%c0_27, %c0_28] : memref<1x4xf32, #tpu.memory_space<vmem>>, vector<1x4xf32>
      %40 = vector.broadcast %39 : vector<1x4xf32> to vector<4x4xf32>
      %41 = arith.mulf %38, %40 : vector<4x4xf32>
      %cst_29 = arith.constant dense<0.000000e+00> : vector<4xf32>
      %42 = vector.multi_reduction <add>, %41, %cst_29 [1] : vector<4x4xf32> to vector<4xf32>
      %43 = vector.shape_cast %42 : vector<4xf32> to vector<4x1xf32>
      %c0_30 = arith.constant 0 : index
      %c0_31 = arith.constant 0 : index
      %44 = vector.load %arg4[%c0_30, %c0_31] : memref<1x1xf32, #tpu.memory_space<vmem>>, vector<1x1xf32>
      %45 = vector.broadcast %44 : vector<1x1xf32> to vector<4x1xf32>
      %46 = arith.addf %43, %45 : vector<4x1xf32>
      %cst_32 = arith.constant 0.000000e+00 : f32
      %47 = vector.broadcast %cst_32 : f32 to vector<4x1xf32>
      %48 = arith.maximumf %46, %47 : vector<4x1xf32>
      %c0_33 = arith.constant 0 : index
      %c0_34 = arith.constant 0 : index
      %49 = vector.load %arg5[%c0_33, %c0_34] : memref<1x4xf32, #tpu.memory_space<vmem>>, vector<1x4xf32>
      %50 = vector.broadcast %48 : vector<4x1xf32> to vector<4x4xf32>
      %51 = vector.broadcast %49 : vector<1x4xf32> to vector<4x4xf32>
      %52 = arith.mulf %50, %51 : vector<4x4xf32>
      %c0_35 = arith.constant 0 : index
      %c0_36 = arith.constant 0 : index
      %53 = vector.load %arg6[%c0_35, %c0_36] : memref<1x4xf32, #tpu.memory_space<vmem>>, vector<1x4xf32>
      %54 = vector.broadcast %53 : vector<1x4xf32> to vector<4x4xf32>
      %55 = arith.addf %52, %54 : vector<4x4xf32>
      %56 = vector.extract_strided_slice %55 {offsets = [0, 0], sizes = [2, 4], strides = [1, 1]} : vector<4x4xf32> to vector<2x4xf32>
      %57 = vector.extract_strided_slice %55 {offsets = [2, 0], sizes = [2, 4], strides = [1, 1]} : vector<4x4xf32> to vector<2x4xf32>
      %58 = arith.addf %56, %57 : vector<2x4xf32>
      %59 = arith.negf %58 : vector<2x4xf32>
      %60 = math.exp %59 : vector<2x4xf32>
      %cst_37 = arith.constant 1.000000e+00 : f32
      %61 = vector.broadcast %cst_37 : f32 to vector<2x4xf32>
      %62 = arith.addf %61, %60 : vector<2x4xf32>
      %63 = arith.divf %61, %62 : vector<2x4xf32>
      %c0_38 = arith.constant 0 : index
      %c0_39 = arith.constant 0 : index
      %64 = vector.load %arg7[%c0_38, %c0_39] : memref<2x4xf32, #tpu.memory_space<vmem>>, vector<2x4xf32>
      tpu.vector_store %arg7[%c0_38, %c0_39], %63 {strides = array<i32>} : memref<2x4xf32, #tpu.memory_space<vmem>>, vector<2x4xf32>,
    } else {
    }
    return
  }
  func.func @transform_0(%arg0: i32, %arg1: i32) -> (i32, i32) {
    %c0_i32 = arith.constant 0 : i32
    return %arg0, %arg1 : i32, i32
  }
  func.func @transform_1(%arg0: i32, %arg1: i32) -> (i32, i32) {
    %c0_i32 = arith.constant 0 : i32
    %c0_i32_0 = arith.constant 0 : i32
    %c0_i32_1 = arith.constant 0 : i32
    return %c0_i32, %c0_i32_0 : i32, i32
  }
  func.func @transform_2(%arg0: i32, %arg1: i32) -> (i32, i32) {
    %c0_i32 = arith.constant 0 : i32
    %c0_i32_0 = arith.constant 0 : i32
    %c0_i32_1 = arith.constant 0 : i32
    return %c0_i32, %c0_i32_0 : i32, i32
  }
  func.func @transform_3(%arg0: i32, %arg1: i32) -> (i32, i32) {
    %c0_i32 = arith.constant 0 : i32
    %c0_i32_0 = arith.constant 0 : i32
    %c0_i32_1 = arith.constant 0 : i32
    return %c0_i32, %c0_i32_0 : i32, i32
  }
  func.func @transform_4(%arg0: i32, %arg1: i32) -> (i32, i32) {
    %c0_i32 = arith.constant 0 : i32
    %c0_i32_0 = arith.constant 0 : i32
    %c0_i32_1 = arith.constant 0 : i32
    return %c0_i32, %c0_i32_0 : i32, i32
  }
  func.func @transform_5(%arg0: i32, %arg1: i32) -> (i32, i32) {
    %c0_i32 = arith.constant 0 : i32
    %c0_i32_0 = arith.constant 0 : i32
    return %arg0, %c0_i32 : i32, i32
  }
}

</mosaic_0001>

<bundles_post_ra>
// kernel: tpu_custom_call.1
= control target key start
LH: loop header
LB: loop body
LE: loop exit
PB: predicated region body
PF: predicated region fallthrough
CT: control target
= control target key end

     0   :  { %s386_s0 = inlined_call_operand.hbm [shape: f32[2,1024], index: 0, kind: input, shape index: {}]   ;;  %s387_s1 = inlined_call_operand.vmem [shape: f32[1,4], index: 1, kind: input, shape index: {}]   ;;  %s388_s2 = inlined_call_operand.<no memory space> [shape: f32[1,1], index: 2, kind: input, shape index: {}]   ;;  %s389_s3 = inlined_call_operand.vmem [shape: f32[1,4], index: 3, kind: input, shape index: {}]   ;;  %s390_s4 = inlined_call_operand.vmem [shape: f32[1,4], index: 4, kind: input, shape index: {}]   ;;  %s391_s5 = inlined_call_operand.hbm [shape: f32[2,4], index: 5, kind: output, shape index: {}]  }
   0x1   :  { %v10_v0 = vstv %s388_s2 }
   0x2   :  { %11 = vst [vmem:[#allocation4] sm:$0x1] %v10_v0 }
   0x3   :  { %12 = vsyncpa [#allocation6], 0 }
   0x4   :  { %13 = vsyncpa [#allocation7], 0  ;;  %s293_s20 = smov [#allocation5]   ;;  %s245_s24 = scalar_lea.hbm %s386_s0, 256 }
   0x5   :  { %s20_s21 = sshll.u32 %s293_s20, 4  ;;  %p246_p0 = scmp.ne.s32.totalorder %s386_s0, %s245_s24  ;;  %s21_s21 = int_to_ptr.vmem [resolvable:$true] %s20_s21 }
   0x6   :  { %p249_p1 = scmp.lt.u32.totalorder %s245_s24, %s386_s0 }
   0x8   :  { %p251_p2 = pnand %p249_p1, %p246_p0 }
   0xa   :  { %254 = shalt.err (!%p251_p2)
}
   0xb   :  { %s255_s2 = scalar_lea.vmem %s21_s21, 256  ;;  %p260_p4 = scmp.lt.s32.totalorder %s21_s21, %s21_s21 }
   0xc   :  { %p256_p3 = scmp.ne.s32.totalorder %s21_s21, %s255_s2  ;;  %p261_p5 = scmp.lt.s32.totalorder %s255_s2, %s255_s2 }
   0xe   :  { %p262_p6 = por %p261_p5, %p260_p4 }
  0x10   :  { %p263_p7 = pnand %p262_p6, %p256_p3 }
  0x12   :  { %266 = shalt.err (!%p263_p7)
}
  0x13   :  { %23 = dma.hbm_to_vmem [thread:$0]  %s386_s0, 256, %s21_s21, [#allocation6]  }
  0x14   :  { %289 = dma.done.wait [#allocation6], 256  }
  0x15   :  { %290 = vsyncadd [#allocation6], 4294967040  ;;  %vm54_vm0 = vcmask 1041408   ;;  %vm39_vm1 = vcmask 25600   ;;  %v294_v33 = vmov -inf   ;;  %v295_v34 = vmov 0.0  }
  0x16   :  { %v226_v1 = vld.sshfl [vmem:[#allocation5 + $0x4] sm:$0x33 pattern:$0x76325410]  ;;  %41 = vst.msk [vmem:[#allocation3] sm:$0x3] %vm39_vm1, %v294_v33 }
  0x17   :  { %v74_v2 = vcombine.high %v226_v1, %v226_v1  ;;  %v77_v3 = vsel %vm54_vm0, %v226_v1, 0.0  ;;  %v225_v4 = vld.sshfl [vmem:[#allocation5] sm:$0x33 pattern:$0x76325410]  ;;  %v82_v7 = vsel %vm54_vm0, %v226_v1, -inf }
  0x18   :  { %v51_v5 = vcombine.high %v225_v4, %v225_v4  ;;  %v55_v6 = vsel %vm54_vm0, %v225_v4, 0.0  ;;  %v227_v8 = vld.sshfl [vmem:[#allocation5 + $0x8] sm:$0x33 pattern:$0x76325410]  ;;  %v60_v11 = vsel %vm54_vm0, %v225_v4, -inf }
  0x19   :  { %v78_v9 = vsel %vm54_vm0, %v74_v2, 0.0  ;;  %v83_v10 = vsel %vm54_vm0, %v74_v2, -inf  ;;  %v96_v12 = vcombine.high %v227_v8, %v227_v8  ;;  %v228_v16 = vld.sshfl [vmem:[#allocation5 + $0xc] sm:$0x33 pattern:$0x76325410] }
  0x1a   :  { %v79_v13 = vadd.f32 %v78_v9, %v77_v3  ;;  %v56_v14 = vsel %vm54_vm0, %v51_v5, 0.0  ;;  %v61_v15 = vsel %vm54_vm0, %v51_v5, -inf  ;;  %v84_v18 = vmax.f32 %v82_v7, %v83_v10  ;;  %40 = vst.msk [vmem:[#allocation2] sm:$0x3] %vm39_vm1, %v295_v34  ;;  %v229_v57 = vld [vmem:[%s387_s1] ss:$0 sm:$0xff] }
  0x1b   :  { %v57_v17 = vadd.f32 %v56_v14, %v55_v6  ;;  %v62_v19 = vmax.f32 %v60_v11, %v61_v15  ;;  %v104_v20 = vsel %vm54_vm0, %v227_v8, -inf  ;;  %v105_v21 = vsel %vm54_vm0, %v96_v12, -inf  ;;  %v230_v62 = vld [vmem:[#allocation4] ss:$0 sm:$0xff]  ;;  %v231_v2 = vld [vmem:[%s389_s3] ss:$0 sm:$0xff] }
  0x1c   :  { %80 = vadd.xlane.f32.xlu1 %v79_v13  ;;  %v118_v22 = vcombine.high %v228_v16, %v228_v16  ;;  %v99_v23 = vsel %vm54_vm0, %v227_v8, 0.0  ;;  %v100_v24 = vsel %vm54_vm0, %v96_v12, 0.0  ;;  %v106_v25 = vmax.f32 %v104_v20, %v105_v21  ;;  %v232_v3 = vld [vmem:[%s390_s4] ss:$0 sm:$0xff]  ;;  %s297_s10 = smov [#allocation8]  }
  0x1d   :  { %58 = vadd.xlane.f32.xlu0 %v57_v17  ;;  %v101_v26 = vadd.f32 %v100_v24, %v99_v23  ;;  %v126_v27 = vsel %vm54_vm0, %v228_v16, -inf  ;;  %v121_v29 = vsel %vm54_vm0, %v228_v16, 0.0  ;;  %vm131_vm2 = vcmask 7168   ;;  %v144_v42 = vld [vmem:[#allocation3] sm:$0x3]  ;;  %s216_s11 = sshll.u32 %s297_s10, 4  ;;  %s217_s11 = int_to_ptr.vmem [resolvable:$true] %s216_s11 }
  0x1e   :  { %v127_v28 = vsel %vm54_vm0, %v118_v22, -inf  ;;  %v122_v30 = vsel %vm54_vm0, %v118_v22, 0.0  ;;  %vm133_vm3 = vcmask 15360   ;;  %vm135_vm4 = vcmask 23552   ;;  %s267_s3 = scalar_lea.vmem %s217_s11, 32  ;;  %p272_p9 = scmp.lt.s32.totalorder %s217_s11, %s217_s11 }
  0x1f   :  { %v128_v31 = vmax.f32 %v126_v27, %v127_v28  ;;  %v123_v32 = vadd.f32 %v122_v30, %v121_v29  ;;  %vm165_vm5 = vcmask 27648   ;;  %v296_v61 = vmov 0   ;;  %p268_p8 = scmp.ne.s32.totalorder %s217_s11, %s267_s3  ;;  %p273_p10 = scmp.lt.s32.totalorder %s267_s3, %s267_s3 }
  0x20   :  { %85 = vmax.xlane.f32.xlu1 %v84_v18  ;;  %240 = vset.pattern.permute.xlu0 %v296_v61 }
  0x21   :  { %63 = vmax.xlane.f32.xlu0 %v62_v19  ;;  %v140_v46 = vld [vmem:[#allocation2] sm:$0x3]  ;;  %239 = vset.pattern.permute.xlu1 %v296_v61  ;;  %p274_p11 = por %p273_p10, %p272_p9 }
  0x23   :  { %p275_p12 = pnand %p274_p11, %p268_p8 }
  0x24   :  { %107 = vmax.xlane.f32.xlu1 %v106_v25 }
  0x25   :  { %102 = vadd.xlane.f32.xlu0 %v101_v26 }
  0x28   :  { %129 = vmax.xlane.f32.xlu1 %v128_v31 }
  0x29   :  { %124 = vadd.xlane.f32.xlu0 %v123_v32 }
  0xa9   :  { %v81_v35 = vpop.xlane.xlu1 %80 }
  0xaa   :  { %v59_v36 = vpop.xlane.xlu0 %58 }
  0xab   :  { %v132_v43 = vsel %vm131_vm2, %v59_v36, %v81_v35 }
  0xad   :  { %v86_v37 = vpop.xlane.xlu1 %85 }
  0xae   :  { %v64_v38 = vpop.xlane.xlu0 %63 }
  0xaf   :  { %v137_v41 = vsel %vm131_vm2, %v64_v38, %v86_v37 }
  0xb1   :  { %v108_v39 = vpop.xlane.xlu1 %107 }
  0xb2   :  { %v103_v40 = vpop.xlane.xlu0 %102  ;;  %v138_v44 = vsel %vm133_vm3, %v137_v41, %v108_v39 }
  0xb3   :  { %v134_v47 = vsel %vm133_vm3, %v132_v43, %v103_v40 }
  0xb5   :  { %v130_v45 = vpop.xlane.xlu1 %129 }
  0xb6   :  { %v139_v48 = vsel %vm135_vm4, %v138_v44, %v130_v45  ;;  %v125_v49 = vpop.xlane.xlu0 %124 }
  0xb7   :  { %v145_v50 = vmax.f32 %v144_v42, %v139_v48  ;;  %v136_v51 = vsel %vm135_vm4, %v134_v47, %v125_v49 }
  0xb8   :  { %v141_v52 = vadd.f32 %v140_v46, %v136_v51 }
  0xb9   :  { %146 = vst.msk [vmem:[#allocation3] sm:$0x3] %vm39_vm1, %v145_v50 }
  0xba   :  { %143 = vst.msk [vmem:[#allocation2] sm:$0x3] %vm39_vm1, %v141_v52 }
  0xc0   :  { %v152_v53 = vld [vmem:[#allocation3] sm:$0x3] }
  0xc1   :  { %v150_v54 = vld [vmem:[#allocation2] sm:$0x3]  ;;  %v154_v55 = vrot.slane %v152_v53, 6 }
  0xc2   :  { %v151_v56 = vmul.f32 0.00390625, %v150_v54 }
  0xc4   :  { %v156_v58 = vsel %vm54_vm0, %v151_v56, %v154_v55 }
  0xc5   :  { %v164_v59 = vmul.f32 %v229_v57, %v156_v58 }
  0xc7   :  { %v166_v60 = vsel %vm165_vm5, %v164_v59, 0.0 }
  0xc8   :  { %167 = vadd.xlane.f32.xlu0 %v166_v60 }
 0x155   :  { %v168_v63 = vpop.xlane.xlu0 %167 }
 0x156   :  { %v176_v0 = vadd.f32 %v230_v62, %v168_v63 }
 0x158   :  { %v177_v1 = vmax.f32 %v176_v0, 0.0 }
 0x15a   :  { %181 = vperm.xlu1 %239, %v177_v1  }
 0x1d9   :  { %v182_v4 = vpop.permute.xlu1 %181 }
 0x1da   :  { %v190_v5 = vmul.f32 %v231_v2, %v182_v4 }
 0x1dc   :  { %v198_v6 = vadd.f32 %v232_v3, %v190_v5 }
 0x1de   :  { %v200_v7 = vrot.slane %v198_v6, 2 }
 0x1e0   :  { %v202_v8 = vadd.f32 %v200_v7, %v198_v6 }
 0x1e2   :  { %v233_v9 = vmul.f32 -1.442695, %v202_v8 }
 0x1e4   :  { %241 = vpow2.f32 %v233_v9 }
 0x1ee   :  { %v242_v10 = vpop.eup %241 }
 0x1ef   :  { %v206_v11 = vadd.f32 1.0, %v242_v10 }
 0x1f1   :  { %243 = vrcp.f32 %v206_v11 }
 0x1fb   :  { %v244_v12 = vpop.eup %243 }
 0x1fc   :  { %209 = vst.msk [vmem:[#allocation8] sm:$0x3] %vm39_vm1, %v244_v12 }
 0x1fd   :  { %278 = shalt.err (!%p275_p12)
}
 0x1fe   :  { %s279_s13 = scalar_lea.hbm %s391_s5, 32 }
 0x1ff   :  { %p280_p13 = scmp.ne.s32.totalorder %s391_s5, %s279_s13  ;;  %p283_p0 = scmp.lt.u32.totalorder %s279_s13, %s391_s5 }
 0x201   :  { %p285_p1 = pnand %p283_p0, %p280_p13 }
 0x203   :  { %288 = shalt.err (!%p285_p1)
}
 0x204   :  { %219 = dma.vmem_to_hbm [thread:$0]  %s217_s11, 32, %s391_s5, [#allocation7]  }
 0x205   :  { %291 = dma.done.wait [#allocation7], 32  }
 0x206   :  { %292 = vsyncadd [#allocation7], 4294967264 }
 0x207   :  { %223 = vsyncpa [#allocation6], 1 }
 0x208   :  { %224 = vsyncpa [#allocation7], 1 }

</bundles_post_ra>
